<compile_context>
chip_gen: v7x
topology: tpu7x:2x2x1
jax: 0.10.0
libtpu: 0.0.40
codegen_flags: <defaults>
</compile_context>

<pallas_src>
import functools

import jax
import jax.numpy as jnp
from jax.experimental import pallas as pl
from jax.experimental.pallas import tpu as pltpu

CONFIG = {
    "layers": [128, 64, 32],
    "latent_dim_mf": 16,
    "latent_dim_mlp": 16,
    "dropout_rate_mf": 0.2,
    "dropout_rate_mlp": 0.2,
}


def _round_up(x, m):
    return ((x + m - 1) // m) * m


def _keep_mask(seed_u32, row0, shape, *, salt, p):
    """Inverted-dropout keep mask from a counter-based hash (portable PRNG).

    The mask depends only on (seed, global element position), so it is
    invariant to the batch tiling and independent across tiles.  Pure VPU
    integer ops; compare raw bits against an integer threshold (no
    int->float conversion).
    """
    rows = (jax.lax.broadcasted_iota(jnp.int32, shape, 0) + row0).astype(jnp.uint32)
    cols = jax.lax.broadcasted_iota(jnp.int32, shape, 1).astype(jnp.uint32)
    x = rows * jnp.uint32(0x9E3779B1) + cols * jnp.uint32(0x85EBCA77)
    x = x ^ (seed_u32 * jnp.uint32(0xC2B2AE3D) + jnp.uint32(salt * 0x27D4EB2F))
    # murmur3-style finalizer
    x = x ^ (x >> 16)
    x = x * jnp.uint32(0x7FEB352D)
    x = x ^ (x >> 15)
    x = x * jnp.uint32(0x846CA68B)
    x = x ^ (x >> 16)
    bits = (x >> 1).astype(jnp.int32)                       # 31 random bits
    thresh = jnp.int32(min(int(p * 2147483648.0), 2147483647))
    return (bits >= thresh).astype(jnp.float32)             # P(keep) = 1 - p


def neumf_kernel(
    # scalars (SMEM)
    seed_ref,
    # per-tile activations (VMEM, bf16)
    x_mlp_ref, ue_mf_ref, ie_mf_ref,
    # resident parameters (VMEM)
    w1_ref, b1_ref, w2_ref, b2_ref, w3_ref, b3_ref,
    wl_mlp_ref, wl_mf_ref, bl_ref,
    # output (VMEM)
    out_ref,
    *, p_mf, p_mlp, tb,
):
    row0 = pl.program_id(0) * tb                    # global row offset of tile
    seed_u = seed_ref[0].astype(jnp.uint32)

    # --- GMF branch: elementwise product + dropout (VPU) --------------------
    mf = ue_mf_ref[...].astype(jnp.float32) * ie_mf_ref[...].astype(jnp.float32)
    if p_mf > 0.0:
        mf = mf * _keep_mask(seed_u, row0, mf.shape, salt=1, p=p_mf)
        mf = mf * (1.0 / (1.0 - p_mf))

    # --- MLP branch: concat folded in wrapper; bf16 matmuls, f32 accumulate -
    h = jnp.dot(x_mlp_ref[...], w1_ref[...],
                preferred_element_type=jnp.float32) + b1_ref[...]
    h = jnp.maximum(h, 0.0)
    h = jnp.dot(h.astype(jnp.bfloat16), w2_ref[...],
                preferred_element_type=jnp.float32) + b2_ref[...]
    h = jnp.maximum(h, 0.0)
    h = jnp.dot(h.astype(jnp.bfloat16), w3_ref[...],
                preferred_element_type=jnp.float32) + b3_ref[...]
    h = jnp.maximum(h, 0.0)                                 # (TB, 32)
    if p_mlp > 0.0:
        h = h * _keep_mask(seed_u, row0, h.shape, salt=2, p=p_mlp)
        h = h * (1.0 / (1.0 - p_mlp))

    # --- logits: concat([h, mf]) @ W_l folded into two skinny trans-B
    #     contractions producing a lane-dense (1, TB) row. -------------------
    dn = (((1,), (1,)), ((), ()))     # contract feature dims: (1,F)x(TB,F)->(1,TB)
    logits = (
        jax.lax.dot_general(wl_mlp_ref[...], h.astype(jnp.bfloat16), dn,
                            preferred_element_type=jnp.float32)
        + jax.lax.dot_general(wl_mf_ref[...], mf.astype(jnp.bfloat16), dn,
                              preferred_element_type=jnp.float32)
        + bl_ref[...]
    )                                                       # (1, TB)
    out_ref[...] = jax.nn.sigmoid(logits)[None]             # (1, 1, TB)


def init_params(key, num_users, num_items, config):
    dims = config["layers"]
    d_mf = config["latent_dim_mf"]
    d_mlp = config["latent_dim_mlp"]
    ks = jax.random.split(key, 8)

    def lin(k, fan_in, fan_out):
        # torch.nn.Linear default init: U(-1/sqrt(fan_in), 1/sqrt(fan_in))
        bound = 1.0 / float(fan_in) ** 0.5
        kw, kb = jax.random.split(k)
        w = jax.random.uniform(kw, (fan_in, fan_out), jnp.float32, -bound, bound)
        b = jax.random.uniform(kb, (1, fan_out), jnp.float32, -bound, bound)
        return w, b

    w1, b1 = lin(ks[4], 2 * d_mlp, dims[0])
    w2, b2 = lin(ks[5], dims[0], dims[1])
    w3, b3 = lin(ks[6], dims[1], dims[2])
    wl, bl = lin(ks[7], dims[2] + d_mf, 1)                  # (48, 1)

    emb = lambda k, n, d: jax.random.normal(k, (n, d), jnp.float32)
    return {
        # bf16 storage halves HBM traffic for gathered embedding rows.
        "emb_user_mf": emb(ks[0], num_users, d_mf).astype(jnp.bfloat16),
        "emb_item_mf": emb(ks[1], num_items, d_mf).astype(jnp.bfloat16),
        "emb_user_mlp": emb(ks[2], num_users, d_mlp).astype(jnp.bfloat16),
        "emb_item_mlp": emb(ks[3], num_items, d_mlp).astype(jnp.bfloat16),
        "w1": w1.astype(jnp.bfloat16), "b1": b1,            # (32,128) / (1,128)
        "w2": w2.astype(jnp.bfloat16), "b2": b2,            # (128,64) / (1,64)
        "w3": w3.astype(jnp.bfloat16), "b3": b3,            # (64,32)  / (1,32)
        # logits weight split so the [mlp, mf] concat folds into two rows.
        "wl_mlp": wl[:dims[2]].T.astype(jnp.bfloat16),      # (1, 32)
        "wl_mf": wl[dims[2]:].T.astype(jnp.bfloat16),       # (1, 16)
        "bl": bl,                                           # (1, 1)
    }


def neumf_forward(params, user_indices, item_indices, seed, config,
                  *, tb=512, training=True):
    d_mf = config["latent_dim_mf"]
    d_mlp = config["latent_dim_mlp"]

    B = user_indices.shape[0]
    TB = tb if B >= tb else _round_up(B, 8)
    B_pad = _round_up(B, TB)
    G = B_pad // TB

    if B_pad != B:
        pad = B_pad - B
        user_indices = jnp.concatenate(
            [user_indices, jnp.zeros((pad,), user_indices.dtype)])
        item_indices = jnp.concatenate(
            [item_indices, jnp.zeros((pad,), item_indices.dtype)])

    # Embedding gathers + MLP concat (pure indexing glue, stays in JAX).
    # TODO(synk): gather rows inside the kernel (scalar-prefetched indices +
    # per-tile DMA from HBM tables) to avoid the gather->HBM->kernel round trip.
    ue_mlp = jnp.take(params["emb_user_mlp"], user_indices, axis=0)
    ie_mlp = jnp.take(params["emb_item_mlp"], item_indices, axis=0)
    x_mlp = jnp.concatenate([ue_mlp, ie_mlp], axis=-1)      # (B_pad, 2*d_mlp) bf16
    ue_mf = jnp.take(params["emb_user_mf"], user_indices, axis=0)
    ie_mf = jnp.take(params["emb_item_mf"], item_indices, axis=0)

    kernel = functools.partial(
        neumf_kernel,
        p_mf=config["dropout_rate_mf"] if training else 0.0,
        p_mlp=config["dropout_rate_mlp"] if training else 0.0,
        tb=TB,
    )

    def act_spec(feat):
        return pl.BlockSpec((TB, feat), lambda i: (i, 0))

    def const_spec(shape):
        return pl.BlockSpec(shape, lambda i: (0,) * len(shape))

    out = pl.pallas_call(
        kernel,
        out_shape=jax.ShapeDtypeStruct((G, 1, TB), jnp.float32),
        grid=(G,),
        in_specs=[
            pl.BlockSpec(memory_space=pltpu.MemorySpace.SMEM),   # seed
            act_spec(2 * d_mlp), act_spec(d_mf), act_spec(d_mf),
            const_spec(params["w1"].shape), const_spec(params["b1"].shape),
            const_spec(params["w2"].shape), const_spec(params["b2"].shape),
            const_spec(params["w3"].shape), const_spec(params["b3"].shape),
            const_spec(params["wl_mlp"].shape), const_spec(params["wl_mf"].shape),
            const_spec(params["bl"].shape),
        ],
        out_specs=pl.BlockSpec((1, 1, TB), lambda i: (i, 0, 0)),
        compiler_params=pltpu.CompilerParams(
            dimension_semantics=("parallel",)),
    )(
        seed,
        x_mlp, ue_mf, ie_mf,
        params["w1"], params["b1"],
        params["w2"], params["b2"],
        params["w3"], params["b3"],
        params["wl_mlp"], params["wl_mf"], params["bl"],
    )

    # (G, 1, TB) -> (B, 1), dropping padded rows.
    return out.reshape(B_pad, 1)[:B]


if __name__ == "__main__":
    key = jax.random.PRNGKey(0)
    k_params, k_u, k_i = jax.random.split(key, 3)

    num_users, num_items, batch = 32, 48, 8
    params = init_params(k_params, num_users, num_items, CONFIG)

    user_indices = jax.random.randint(k_u, (batch,), 0, num_users, dtype=jnp.int32)
    item_indices = jax.random.randint(k_i, (batch,), 0, num_items, dtype=jnp.int32)
    seed = jnp.array([42], dtype=jnp.int32)

    out = neumf_forward(params, user_indices, item_indices, seed, CONFIG)
    out = jax.block_until_ready(out)
    assert out.shape == (batch, 1)
    assert bool(jnp.all((out >= 0.0) & (out <= 1.0)))
    print("KERNEL_OK")
</pallas_src>

<mosaic_0001>
module attributes {stable_mosaic.version = 11 : i64} {
  func.func @neumf_kernel(%arg0: i32, %arg1: memref<1xi32, #tpu.memory_space<smem>>, %arg2: memref<8x32xbf16, #tpu.memory_space<vmem>>, %arg3: memref<8x16xbf16, #tpu.memory_space<vmem>>, %arg4: memref<8x16xbf16, #tpu.memory_space<vmem>>, %arg5: memref<32x128xbf16, #tpu.memory_space<vmem>>, %arg6: memref<1x128xf32, #tpu.memory_space<vmem>>, %arg7: memref<128x64xbf16, #tpu.memory_space<vmem>>, %arg8: memref<1x64xf32, #tpu.memory_space<vmem>>, %arg9: memref<64x32xbf16, #tpu.memory_space<vmem>>, %arg10: memref<1x32xf32, #tpu.memory_space<vmem>>, %arg11: memref<1x32xbf16, #tpu.memory_space<vmem>>, %arg12: memref<1x16xbf16, #tpu.memory_space<vmem>>, %arg13: memref<1x1xf32, #tpu.memory_space<vmem>>, %arg14: memref<1x1x8xf32, #tpu.memory_space<vmem>>) attributes {dimension_semantics = [#tpu.dimension_semantics<parallel>], iteration_bounds = array<i64: 1>, scalar_prefetch = 0 : i64, scratch_operands = 0 : i64, tpu.core_type = #tpu.core_type<tc>, window_params = [{transform_indices = @transform_0, window_bounds = array<i64: 1>}, {transform_indices = @transform_1, window_bounds = array<i64: 8, 32>}, {transform_indices = @transform_2, window_bounds = array<i64: 8, 16>}, {transform_indices = @transform_3, window_bounds = array<i64: 8, 16>}, {pipeline_mode = #tpu.pipeline_mode<synchronous>, transform_indices = @transform_4, window_bounds = array<i64: 32, 128>}, {pipeline_mode = #tpu.pipeline_mode<synchronous>, transform_indices = @transform_5, window_bounds = array<i64: 1, 128>}, {pipeline_mode = #tpu.pipeline_mode<synchronous>, transform_indices = @transform_6, window_bounds = array<i64: 128, 64>}, {pipeline_mode = #tpu.pipeline_mode<synchronous>, transform_indices = @transform_7, window_bounds = array<i64: 1, 64>}, {pipeline_mode = #tpu.pipeline_mode<synchronous>, transform_indices = @transform_8, window_bounds = array<i64: 64, 32>}, {pipeline_mode = #tpu.pipeline_mode<synchronous>, transform_indices = @transform_9, window_bounds = array<i64: 1, 32>}, {pipeline_mode = #tpu.pipeline_mode<synchronous>, transform_indices = @transform_10, window_bounds = array<i64: 1, 32>}, {pipeline_mode = #tpu.pipeline_mode<synchronous>, transform_indices = @transform_11, window_bounds = array<i64: 1, 16>}, {pipeline_mode = #tpu.pipeline_mode<synchronous>, transform_indices = @transform_12, window_bounds = array<i64: 1, 1>}, {transform_indices = @transform_13, window_bounds = array<i64: 1, 1, 8>}]} {
    %c8_i32 = arith.constant 8 : i32
    %0 = arith.muli %arg0, %c8_i32 : i32
    %c0 = arith.constant 0 : index
    %1 = memref.load %arg1[%c0] : memref<1xi32, #tpu.memory_space<smem>>
    %c0_0 = arith.constant 0 : index
    %c0_1 = arith.constant 0 : index
    %2 = vector.load %arg3[%c0_0, %c0_1] : memref<8x16xbf16, #tpu.memory_space<vmem>>, vector<8x16xbf16>
    %3 = arith.extf %2 : vector<8x16xbf16> to vector<8x16xf32>
    %c0_2 = arith.constant 0 : index
    %c0_3 = arith.constant 0 : index
    %4 = vector.load %arg4[%c0_2, %c0_3] : memref<8x16xbf16, #tpu.memory_space<vmem>>, vector<8x16xbf16>
    %5 = arith.extf %4 : vector<8x16xbf16> to vector<8x16xf32>
    %6 = arith.mulf %3, %5 : vector<8x16xf32>
    %7 = tpu.iota {dimensions = array<i32: 0>} : vector<8x16xi32>
    %8 = vector.broadcast %0 : i32 to vector<8x16xi32>
    %9 = arith.addi %7, %8 : vector<8x16xi32>
    %10 = tpu.iota {dimensions = array<i32: 1>} : vector<8x16xi32>
    %c-1640531535_i32 = arith.constant -1640531535 : i32
    %11 = vector.broadcast %c-1640531535_i32 : i32 to vector<8x16xi32>
    %12 = arith.muli %9, %11 : vector<8x16xi32>
    %c-2048144777_i32 = arith.constant -2048144777 : i32
    %13 = vector.broadcast %c-2048144777_i32 : i32 to vector<8x16xi32>
    %14 = arith.muli %10, %13 : vector<8x16xi32>
    %15 = arith.addi %12, %14 : vector<8x16xi32>
    %c-1028477379_i32 = arith.constant -1028477379 : i32
    %16 = arith.muli %1, %c-1028477379_i32 : i32
    %c668265263_i32 = arith.constant 668265263 : i32
    %17 = arith.addi %16, %c668265263_i32 : i32
    %18 = vector.broadcast %17 : i32 to vector<8x16xi32>
    %19 = arith.xori %15, %18 : vector<8x16xi32>
    %c16_i32 = arith.constant 16 : i32
    %20 = vector.broadcast %c16_i32 : i32 to vector<8x16xi32>
    %21 = arith.shrui %19, %20 : vector<8x16xi32>
    %22 = arith.xori %19, %21 : vector<8x16xi32>
    %c2146121005_i32 = arith.constant 2146121005 : i32
    %23 = vector.broadcast %c2146121005_i32 : i32 to vector<8x16xi32>
    %24 = arith.muli %22, %23 : vector<8x16xi32>
    %c15_i32 = arith.constant 15 : i32
    %25 = vector.broadcast %c15_i32 : i32 to vector<8x16xi32>
    %26 = arith.shrui %24, %25 : vector<8x16xi32>
    %27 = arith.xori %24, %26 : vector<8x16xi32>
    %c-2073254261_i32 = arith.constant -2073254261 : i32
    %28 = vector.broadcast %c-2073254261_i32 : i32 to vector<8x16xi32>
    %29 = arith.muli %27, %28 : vector<8x16xi32>
    %c16_i32_4 = arith.constant 16 : i32
    %30 = vector.broadcast %c16_i32_4 : i32 to vector<8x16xi32>
    %31 = arith.shrui %29, %30 : vector<8x16xi32>
    %32 = arith.xori %29, %31 : vector<8x16xi32>
    %c1_i32 = arith.constant 1 : i32
    %33 = vector.broadcast %c1_i32 : i32 to vector<8x16xi32>
    %34 = arith.shrui %32, %33 : vector<8x16xi32>
    %c429496729_i32 = arith.constant 429496729 : i32
    %35 = vector.broadcast %c429496729_i32 : i32 to vector<8x16xi32>
    %36 = arith.cmpi sge, %34, %35 : vector<8x16xi32>
    %37 = arith.extui %36 : vector<8x16xi1> to vector<8x16xi32>
    %38 = arith.sitofp %37 : vector<8x16xi32> to vector<8x16xf32>
    %39 = arith.mulf %6, %38 : vector<8x16xf32>
    %cst = arith.constant 1.250000e+00 : f32
    %40 = vector.broadcast %cst : f32 to vector<8x16xf32>
    %41 = arith.mulf %39, %40 : vector<8x16xf32>
    %c0_5 = arith.constant 0 : index
    %c0_6 = arith.constant 0 : index
    %42 = vector.load %arg2[%c0_5, %c0_6] : memref<8x32xbf16, #tpu.memory_space<vmem>>, vector<8x32xbf16>
    %c0_7 = arith.constant 0 : index
    %c0_8 = arith.constant 0 : index
    %43 = vector.load %arg5[%c0_7, %c0_8] : memref<32x128xbf16, #tpu.memory_space<vmem>>, vector<32x128xbf16>
    %cst_9 = arith.constant dense<0.000000e+00> : vector<8x128xf32>
    %44 = tpu.matmul %42, %43, %cst_9 {dimension_numbers = #tpu.dot_dimension_numbers<[1], [0], [0], [1], [0, 0, 1, 1], [], []>} : vector<8x32xbf16>, vector<32x128xbf16>, vector<8x128xf32> -> vector<8x128xf32>
    %c0_10 = arith.constant 0 : index
    %c0_11 = arith.constant 0 : index
    %45 = vector.load %arg6[%c0_10, %c0_11] : memref<1x128xf32, #tpu.memory_space<vmem>>, vector<1x128xf32>
    %46 = vector.broadcast %45 : vector<1x128xf32> to vector<8x128xf32>
    %47 = arith.addf %44, %46 : vector<8x128xf32>
    %cst_12 = arith.constant 0.000000e+00 : f32
    %48 = vector.broadcast %cst_12 : f32 to vector<8x128xf32>
    %49 = arith.maximumf %47, %48 : vector<8x128xf32>
    %50 = arith.truncf %49 : vector<8x128xf32> to vector<8x128xbf16>
    %c0_13 = arith.constant 0 : index
    %c0_14 = arith.constant 0 : index
    %51 = vector.load %arg7[%c0_13, %c0_14] : memref<128x64xbf16, #tpu.memory_space<vmem>>, vector<128x64xbf16>
    %cst_15 = arith.constant dense<0.000000e+00> : vector<8x64xf32>
    %52 = tpu.matmul %50, %51, %cst_15 {dimension_numbers = #tpu.dot_dimension_numbers<[1], [0], [0], [1], [0, 0, 1, 1], [], []>} : vector<8x128xbf16>, vector<128x64xbf16>, vector<8x64xf32> -> vector<8x64xf32>
    %c0_16 = arith.constant 0 : index
    %c0_17 = arith.constant 0 : index
    %53 = vector.load %arg8[%c0_16, %c0_17] : memref<1x64xf32, #tpu.memory_space<vmem>>, vector<1x64xf32>
    %54 = vector.broadcast %53 : vector<1x64xf32> to vector<8x64xf32>
    %55 = arith.addf %52, %54 : vector<8x64xf32>
    %cst_18 = arith.constant 0.000000e+00 : f32
    %56 = vector.broadcast %cst_18 : f32 to vector<8x64xf32>
    %57 = arith.maximumf %55, %56 : vector<8x64xf32>
    %58 = arith.truncf %57 : vector<8x64xf32> to vector<8x64xbf16>
    %c0_19 = arith.constant 0 : index
    %c0_20 = arith.constant 0 : index
    %59 = vector.load %arg9[%c0_19, %c0_20] : memref<64x32xbf16, #tpu.memory_space<vmem>>, vector<64x32xbf16>
    %cst_21 = arith.constant dense<0.000000e+00> : vector<8x32xf32>
    %60 = tpu.matmul %58, %59, %cst_21 {dimension_numbers = #tpu.dot_dimension_numbers<[1], [0], [0], [1], [0, 0, 1, 1], [], []>} : vector<8x64xbf16>, vector<64x32xbf16>, vector<8x32xf32> -> vector<8x32xf32>
    %c0_22 = arith.constant 0 : index
    %c0_23 = arith.constant 0 : index
    %61 = vector.load %arg10[%c0_22, %c0_23] : memref<1x32xf32, #tpu.memory_space<vmem>>, vector<1x32xf32>
    %62 = vector.broadcast %61 : vector<1x32xf32> to vector<8x32xf32>
    %63 = arith.addf %60, %62 : vector<8x32xf32>
    %cst_24 = arith.constant 0.000000e+00 : f32
    %64 = vector.broadcast %cst_24 : f32 to vector<8x32xf32>
    %65 = arith.maximumf %63, %64 : vector<8x32xf32>
    %66 = tpu.iota {dimensions = array<i32: 0>} : vector<8x32xi32>
    %67 = vector.broadcast %0 : i32 to vector<8x32xi32>
    %68 = arith.addi %66, %67 : vector<8x32xi32>
    %69 = tpu.iota {dimensions = array<i32: 1>} : vector<8x32xi32>
    %c-1640531535_i32_25 = arith.constant -1640531535 : i32
    %70 = vector.broadcast %c-1640531535_i32_25 : i32 to vector<8x32xi32>
    %71 = arith.muli %68, %70 : vector<8x32xi32>
    %c-2048144777_i32_26 = arith.constant -2048144777 : i32
    %72 = vector.broadcast %c-2048144777_i32_26 : i32 to vector<8x32xi32>
    %73 = arith.muli %69, %72 : vector<8x32xi32>
    %74 = arith.addi %71, %73 : vector<8x32xi32>
    %c-1028477379_i32_27 = arith.constant -1028477379 : i32
    %75 = arith.muli %1, %c-1028477379_i32_27 : i32
    %c1336530526_i32 = arith.constant 1336530526 : i32
    %76 = arith.addi %75, %c1336530526_i32 : i32
    %77 = vector.broadcast %76 : i32 to vector<8x32xi32>
    %78 = arith.xori %74, %77 : vector<8x32xi32>
    %c16_i32_28 = arith.constant 16 : i32
    %79 = vector.broadcast %c16_i32_28 : i32 to vector<8x32xi32>
    %80 = arith.shrui %78, %79 : vector<8x32xi32>
    %81 = arith.xori %78, %80 : vector<8x32xi32>
    %c2146121005_i32_29 = arith.constant 2146121005 : i32
    %82 = vector.broadcast %c2146121005_i32_29 : i32 to vector<8x32xi32>
    %83 = arith.muli %81, %82 : vector<8x32xi32>
    %c15_i32_30 = arith.constant 15 : i32
    %84 = vector.broadcast %c15_i32_30 : i32 to vector<8x32xi32>
    %85 = arith.shrui %83, %84 : vector<8x32xi32>
    %86 = arith.xori %83, %85 : vector<8x32xi32>
    %c-2073254261_i32_31 = arith.constant -2073254261 : i32
    %87 = vector.broadcast %c-2073254261_i32_31 : i32 to vector<8x32xi32>
    %88 = arith.muli %86, %87 : vector<8x32xi32>
    %c16_i32_32 = arith.constant 16 : i32
    %89 = vector.broadcast %c16_i32_32 : i32 to vector<8x32xi32>
    %90 = arith.shrui %88, %89 : vector<8x32xi32>
    %91 = arith.xori %88, %90 : vector<8x32xi32>
    %c1_i32_33 = arith.constant 1 : i32
    %92 = vector.broadcast %c1_i32_33 : i32 to vector<8x32xi32>
    %93 = arith.shrui %91, %92 : vector<8x32xi32>
    %c429496729_i32_34 = arith.constant 429496729 : i32
    %94 = vector.broadcast %c429496729_i32_34 : i32 to vector<8x32xi32>
    %95 = arith.cmpi sge, %93, %94 : vector<8x32xi32>
    %96 = arith.extui %95 : vector<8x32xi1> to vector<8x32xi32>
    %97 = arith.sitofp %96 : vector<8x32xi32> to vector<8x32xf32>
    %98 = arith.mulf %65, %97 : vector<8x32xf32>
    %cst_35 = arith.constant 1.250000e+00 : f32
    %99 = vector.broadcast %cst_35 : f32 to vector<8x32xf32>
    %100 = arith.mulf %98, %99 : vector<8x32xf32>
    %c0_36 = arith.constant 0 : index
    %c0_37 = arith.constant 0 : index
    %101 = vector.load %arg11[%c0_36, %c0_37] : memref<1x32xbf16, #tpu.memory_space<vmem>>, vector<1x32xbf16>
    %102 = arith.truncf %100 : vector<8x32xf32> to vector<8x32xbf16>
    %cst_38 = arith.constant dense<0.000000e+00> : vector<1x8xf32>
    %103 = tpu.matmul %101, %102, %cst_38 {dimension_numbers = #tpu.dot_dimension_numbers<[1], [1], [0], [0], [0, 0, 1, 0], [], []>} : vector<1x32xbf16>, vector<8x32xbf16>, vector<1x8xf32> -> vector<1x8xf32>
    %c0_39 = arith.constant 0 : index
    %c0_40 = arith.constant 0 : index
    %104 = vector.load %arg12[%c0_39, %c0_40] : memref<1x16xbf16, #tpu.memory_space<vmem>>, vector<1x16xbf16>
    %105 = arith.truncf %41 : vector<8x16xf32> to vector<8x16xbf16>
    %cst_41 = arith.constant dense<0.000000e+00> : vector<1x8xf32>
    %106 = tpu.matmul %104, %105, %cst_41 {dimension_numbers = #tpu.dot_dimension_numbers<[1], [1], [0], [0], [0, 0, 1, 0], [], []>} : vector<1x16xbf16>, vector<8x16xbf16>, vector<1x8xf32> -> vector<1x8xf32>
    %107 = arith.addf %103, %106 : vector<1x8xf32>
    %c0_42 = arith.constant 0 : index
    %c0_43 = arith.constant 0 : index
    %108 = vector.load %arg13[%c0_42, %c0_43] : memref<1x1xf32, #tpu.memory_space<vmem>>, vector<1x1xf32>
    %109 = vector.broadcast %108 : vector<1x1xf32> to vector<1x8xf32>
    %110 = arith.addf %107, %109 : vector<1x8xf32>
    %111 = arith.negf %110 : vector<1x8xf32>
    %112 = math.exp %111 : vector<1x8xf32>
    %cst_44 = arith.constant 1.000000e+00 : f32
    %113 = vector.broadcast %cst_44 : f32 to vector<1x8xf32>
    %114 = arith.addf %113, %112 : vector<1x8xf32>
    %115 = arith.divf %113, %114 : vector<1x8xf32>
    %116 = vector.shape_cast %115 : vector<1x8xf32> to vector<1x1x8xf32>
    %c0_45 = arith.constant 0 : index
    %c0_46 = arith.constant 0 : index
    %c0_47 = arith.constant 0 : index
    %117 = vector.load %arg14[%c0_45, %c0_46, %c0_47] : memref<1x1x8xf32, #tpu.memory_space<vmem>>, vector<1x1x8xf32>
    tpu.vector_store %arg14[%c0_45, %c0_46, %c0_47], %116 {strides = array<i32>} : memref<1x1x8xf32, #tpu.memory_space<vmem>>, vector<1x1x8xf32>,
    return
  }
  func.func @transform_0(%arg0: i32) -> i32 {
    %c0_i32 = arith.constant 0 : i32
    %c0_i32_0 = arith.constant 0 : i32
    return %c0_i32 : i32
  }
  func.func @transform_1(%arg0: i32) -> (i32, i32) {
    %c0_i32 = arith.constant 0 : i32
    %c0_i32_0 = arith.constant 0 : i32
    return %arg0, %c0_i32 : i32, i32
  }
  func.func @transform_2(%arg0: i32) -> (i32, i32) {
    %c0_i32 = arith.constant 0 : i32
    %c0_i32_0 = arith.constant 0 : i32
    return %arg0, %c0_i32 : i32, i32
  }
  func.func @transform_3(%arg0: i32) -> (i32, i32) {
    %c0_i32 = arith.constant 0 : i32
    %c0_i32_0 = arith.constant 0 : i32
    return %arg0, %c0_i32 : i32, i32
  }
  func.func @transform_4(%arg0: i32) -> (i32, i32) {
    %c0_i32 = arith.constant 0 : i32
    %c0_i32_0 = arith.constant 0 : i32
    %c0_i32_1 = arith.constant 0 : i32
    return %c0_i32, %c0_i32_0 : i32, i32
  }
  func.func @transform_5(%arg0: i32) -> (i32, i32) {
    %c0_i32 = arith.constant 0 : i32
    %c0_i32_0 = arith.constant 0 : i32
    %c0_i32_1 = arith.constant 0 : i32
    return %c0_i32, %c0_i32_0 : i32, i32
  }
  func.func @transform_6(%arg0: i32) -> (i32, i32) {
    %c0_i32 = arith.constant 0 : i32
    %c0_i32_0 = arith.constant 0 : i32
    %c0_i32_1 = arith.constant 0 : i32
    return %c0_i32, %c0_i32_0 : i32, i32
  }
  func.func @transform_7(%arg0: i32) -> (i32, i32) {
    %c0_i32 = arith.constant 0 : i32
    %c0_i32_0 = arith.constant 0 : i32
    %c0_i32_1 = arith.constant 0 : i32
    return %c0_i32, %c0_i32_0 : i32, i32
  }
  func.func @transform_8(%arg0: i32) -> (i32, i32) {
    %c0_i32 = arith.constant 0 : i32
    %c0_i32_0 = arith.constant 0 : i32
    %c0_i32_1 = arith.constant 0 : i32
    return %c0_i32, %c0_i32_0 : i32, i32
  }
  func.func @transform_9(%arg0: i32) -> (i32, i32) {
    %c0_i32 = arith.constant 0 : i32
    %c0_i32_0 = arith.constant 0 : i32
    %c0_i32_1 = arith.constant 0 : i32
    return %c0_i32, %c0_i32_0 : i32, i32
  }
  func.func @transform_10(%arg0: i32) -> (i32, i32) {
    %c0_i32 = arith.constant 0 : i32
    %c0_i32_0 = arith.constant 0 : i32
    %c0_i32_1 = arith.constant 0 : i32
    return %c0_i32, %c0_i32_0 : i32, i32
  }
  func.func @transform_11(%arg0: i32) -> (i32, i32) {
    %c0_i32 = arith.constant 0 : i32
    %c0_i32_0 = arith.constant 0 : i32
    %c0_i32_1 = arith.constant 0 : i32
    return %c0_i32, %c0_i32_0 : i32, i32
  }
  func.func @transform_12(%arg0: i32) -> (i32, i32) {
    %c0_i32 = arith.constant 0 : i32
    %c0_i32_0 = arith.constant 0 : i32
    %c0_i32_1 = arith.constant 0 : i32
    return %c0_i32, %c0_i32_0 : i32, i32
  }
  func.func @transform_13(%arg0: i32) -> (i32, i32, i32) {
    %c0_i32 = arith.constant 0 : i32
    %c0_i32_0 = arith.constant 0 : i32
    %c0_i32_1 = arith.constant 0 : i32
    return %arg0, %c0_i32, %c0_i32_0 : i32, i32, i32
  }
}

</mosaic_0001>

<bundles_post_ra>
// kernel: tpu_custom_call.1
= control target key start
LH: loop header
LB: loop body
LE: loop exit
PB: predicated region body
PF: predicated region fallthrough
CT: control target
= control target key end

     0   :  { %s834_s0 = inlined_call_operand.<no memory space> [shape: s32[1], index: 0, kind: input, shape index: {}]   ;;  %s835_s1 = inlined_call_operand.vmem [shape: bf16[8,32], index: 1, kind: input, shape index: {}]   ;;  %s836_s2 = inlined_call_operand.vmem [shape: bf16[8,16], index: 2, kind: input, shape index: {}]   ;;  %s837_s3 = inlined_call_operand.vmem [shape: bf16[8,16], index: 3, kind: input, shape index: {}]   ;;  %s838_s4 = inlined_call_operand.vmem [shape: bf16[32,128], index: 4, kind: input, shape index: {}]   ;;  %s839_s5 = inlined_call_operand.vmem [shape: f32[1,128], index: 5, kind: input, shape index: {}]   ;;  %s840_s6 = inlined_call_operand.vmem [shape: bf16[128,64], index: 6, kind: input, shape index: {}]   ;;  %s841_s7 = inlined_call_operand.vmem [shape: f32[1,64], index: 7, kind: input, shape index: {}]   ;;  %s842_s8 = inlined_call_operand.vmem [shape: bf16[64,32], index: 8, kind: input, shape index: {}]   ;;  %s843_s9 = inlined_call_operand.vmem [shape: f32[1,32], index: 9, kind: input, shape index: {}]   ;;  %s844_s10 = inlined_call_operand.vmem [shape: bf16[1,32], index: 10, kind: input, shape index: {}]   ;;  %s845_s11 = inlined_call_operand.vmem [shape: bf16[1,16], index: 11, kind: input, shape index: {}]   ;;  %s846_s12 = inlined_call_operand.<no memory space> [shape: f32[1,1], index: 12, kind: input, shape index: {}]   ;;  %s847_s13 = inlined_call_operand.hbm [shape: f32[1,1,8], index: 13, kind: output, shape index: {}]  }
   0x1   :  { %v19_v0 = vstv %s846_s12 }
   0x2   :  { %20 = vst [vmem:[#allocation3] sm:$0x1] %v19_v0 }
   0x3   :  { %v599_v1 = vld [vmem:[%s838_s4] sm:$0xff]   ;;  %v641_v2 = vmov 0.0   ;;  %v600_v3 = vld [vmem:[%s838_s4 + $0x8] sm:$0xff]   ;;  %vm642_vm0 = vmmov 0   ;;  %vm107_vm1 = vcmask 261120   ;;  %v603_v7 = vld [vmem:[%s840_s6 + $0x10] sm:$0xff]  }
   0x4   :  { %542 = vmatprep.subr.bf16.mxu0 %v641_v2  ;;  %550 = vmatprep.subr.bf16.mxu1 %v641_v2  ;;  %v601_v4 = vld [vmem:[%s840_s6] sm:$0xff]   ;;  %v602_v5 = vld [vmem:[%s840_s6 + $0x8] sm:$0xff]   ;;  %v604_v8 = vld [vmem:[%s840_s6 + $0x18] sm:$0xff]  }
   0x5   :  { %543 = vmatpush3.bf16.msra.mxu0 %v599_v1  ;;  %546 = vmatprep.mubr.msk.bf16.mxu0 %vm642_vm0, %v641_v2  ;;  %v83_v6 = vld [vmem:[%s835_s1] sm:$0xf] }
   0x6   :  { %544 = vmatprep.subr.bf16.mxu0 %v641_v2  ;;  %566 = vmatprep.mubr.msk.bf16.mxu1 %vm642_vm0, %v641_v2 }
   0x7   :  { %551 = vmatpush3.bf16.msra.mxu1 %v601_v4 }
   0x8   :  { %552 = vmatprep.subr.bf16.mxu1 %v641_v2 }
   0x9   :  { %545 = vmatpush3.bf16.msra.mxu0 %v600_v3 }
   0xa   :  { %570 = vmatprep.subr.bf16.mxu0 %v641_v2 }
   0xb   :  { %553 = vmatpush3.bf16.msra.mxu1 %v602_v5 }
   0xc   :  { %547 = vmatmul.mubr.msk.bf16.vlgmr.msra.gmra.mrb[0].mxu0 %vm107_vm1, %v83_v6  ;;  %554 = vmatprep.subr.bf16.mxu1 %v641_v2 }
   0xd   :  { %578 = vmatprep.mubr.msk.bf16.mxu0 %vm642_vm0, %v641_v2 }
   0xf   :  { %555 = vmatpush3.bf16.msra.mxu1 %v603_v7 }
  0x10   :  { %21 = vsyncpa [#allocation5], 0  ;;  %556 = vmatprep.subr.bf16.mxu1 %v641_v2  ;;  %v605_v9 = vld [vmem:[%s840_s6 + $0x20] sm:$0xff]   ;;  %v606_v10 = vld [vmem:[%s840_s6 + $0x28] sm:$0xff]   ;;  %vm305_vm2 = vcmask 523264   ;;  %v56_v33 = vlaneseq  ;;  %vm371_vm4 = vcmask 130048  }
  0x11   :  { %v607_v11 = vld [vmem:[%s840_s6 + $0x30] sm:$0xff]   ;;  %v608_v12 = vld [vmem:[%s840_s6 + $0x38] sm:$0xff]   ;;  %v609_v13 = vld [vmem:[%s842_s8] sm:$0xff]   ;;  %s65_s20 = smul.u32 3266489917, %s834_s0  ;;  %v643_v0 = vmov 0  }
  0x12   :  { %571 = vmatpush3.bf16.msra.mxu0 %v609_v13  ;;  %v610_v14 = vld [vmem:[%s842_s8 + $0x8] sm:$0xff]   ;;  %v498_v15 = vld [vmem:[%s839_s5] ss:$0 sm:$0xff]  ;;  %v611_v23 = vld [vmem:[%s842_s8 + $0x10] sm:$0xff]   ;;  %v793_v34 = vshrl.u32 %v56_v33, 7  ;;  %v61_v35 = vand.u32 127, %v56_v33  ;;  %598 = vset.pattern.permute.xlu0 %v643_v0 }
  0x13   :  { %557 = vmatpush3.bf16.msra.mxu1 %v604_v8  ;;  %572 = vmatprep.subr.bf16.mxu0 %v641_v2  ;;  %v612_v24 = vld [vmem:[%s842_s8 + $0x18] sm:$0xff]   ;;  %v502_v25 = vld [vmem:[%s841_s7] ss:$0 sm:$0xff]  ;;  %s66_s21 = sadd.s32 668265263, %s65_s20  ;;  %vm481_vm6 = vcmask 57344  }
  0x14   :  { %558 = vmatprep.subr.bf16.mxu1 %v641_v2  ;;  %v62_v36 = vmul.u32 2654435761, %v793_v34  ;;  %v63_v37 = vmul.u32 2246822519, %v61_v35  ;;  %v67_v39 = vstv %s66_s21  ;;  %s350_s1 = sadd.s32 1336530526, %s65_s20 }
  0x15   :  { %v351_v45 = vstv %s350_s1  ;;  %v51_v51 = vld [vmem:[%s836_s2] sm:$0xf] }
  0x16   :  { %573 = vmatpush3.bf16.msra.mxu0 %v610_v14  ;;  %v64_v38 = vadd.s32 %v63_v37, %v62_v36  ;;  %v53_v52 = vld [vmem:[%s837_s3] sm:$0xf]  ;;  %v52_v53 = vunpack.c.l.bf16 %v51_v51 }
  0x17   :  { %559 = vmatpush3.bf16.msra.mxu1 %v605_v9  ;;  %574 = vmatprep.subr.bf16.mxu0 %v641_v2  ;;  %v54_v54 = vunpack.c.l.bf16 %v53_v52  ;;  %v369_v62 = vld [vmem:[%s845_s11] sm:$0x1] }
  0x18   :  { %560 = vmatprep.subr.bf16.mxu1 %v641_v2  ;;  %v68_v40 = vxor.u32 %v67_v39, %v64_v38  ;;  %v352_v47 = vxor.u32 %v351_v45, %v64_v38  ;;  %v464_v63 = vld [vmem:[#allocation3] sm:$0x1] }
  0x19   :  { %v55_v56 = vmul.f32 %v54_v54, %v52_v53  ;;  %467 = vperm.xlu0 %598, %v464_v63  }
  0x1a   :  { %575 = vmatpush3.bf16.msra.mxu0 %v611_v23  ;;  %v69_v41 = vshrl.u32 %v68_v40, 16  ;;  %v353_v1 = vshrl.u32 %v352_v47, 16  ;;  %v367_v23 = vld [vmem:[%s844_s10] sm:$0x1] }
  0x1b   :  { %561 = vmatpush3.bf16.msra.mxu1 %v606_v10  ;;  %576 = vmatprep.subr.bf16.mxu0 %v641_v2 }
  0x1c   :  { %562 = vmatprep.subr.bf16.mxu1 %v641_v2  ;;  %v70_v42 = vxor.u32 %v69_v41, %v68_v40  ;;  %v354_v3 = vxor.u32 %v353_v1, %v352_v47 }
  0x1e   :  { %577 = vmatpush3.bf16.msra.mxu0 %v612_v24  ;;  %v71_v43 = vmul.u32 2146121005, %v70_v42  ;;  %v355_v4 = vmul.u32 2146121005, %v354_v3 }
  0x1f   :  { %563 = vmatpush3.bf16.msra.mxu1 %v607_v11  ;;  %582 = vmatprep.subr.bf16.mxu0 %v641_v2  ;;  %v511_v11 = vld [vmem:[%s843_s9] ss:$0 sm:$0xff]  ;;  %s644_s9 = smov [#allocation4]  }
  0x20   :  { %564 = vmatprep.subr.bf16.mxu1 %v641_v2  ;;  %v72_v44 = vshrl.u32 %v71_v43, 15  ;;  %v356_v5 = vshrl.u32 %v355_v4, 15  ;;  %s489_s10 = sshll.u32 %s644_s9, 4  ;;  %s490_s10 = int_to_ptr.vmem [resolvable:$true] %s489_s10 }
  0x21   :  { %s617_s28 = scalar_lea.vmem %s490_s10, 16  ;;  %s621_s29 = scalar_lea.vmem %s490_s10, 32 }
  0x22   :  { %v73_v46 = vxor.u32 %v72_v44, %v71_v43  ;;  %v357_v6 = vxor.u32 %v356_v5, %v355_v4  ;;  %p618_p0 = scmp.ne.s32.totalorder %s490_s10, %s617_s28  ;;  %p622_p1 = scmp.lt.s32.totalorder %s490_s10, %s490_s10 }
  0x23   :  { %565 = vmatpush3.bf16.msra.mxu1 %v608_v12  ;;  %p623_p2 = scmp.lt.s32.totalorder %s621_s29, %s617_s28 }
  0x24   :  { %v74_v48 = vmul.u32 2221713035, %v73_v46  ;;  %v358_v7 = vmul.u32 2221713035, %v357_v6 }
  0x25   :  { %p624_p3 = por %p623_p2, %p622_p1 }
  0x26   :  { %v75_v49 = vshrl.u32 %v74_v48, 16  ;;  %v359_v8 = vshrl.u32 %v358_v7, 16 }
  0x27   :  { %p625_p4 = pnand %p624_p3, %p618_p0 }
  0x28   :  { %v76_v50 = vxor.u32 %v75_v49, %v74_v48  ;;  %v360_v9 = vxor.u32 %v359_v8, %v358_v7 }
  0x2a   :  { %v77_v55 = vshrl.u32 %v76_v50, 1  ;;  %v361_v10 = vshrl.u32 %v360_v9, 1 }
  0x2c   :  { %vm78_vm3 = vcmp.ge.s32.totalorder %v77_v55, 429496729  ;;  %vm362_vm5 = vcmp.ge.s32.totalorder %v361_v10, 429496729 }
  0x2d   :  { %v497_v57 = vsel %vm78_vm3, 1.0, %v641_v2 }
  0x2e   :  { %v81_v58 = vmul.f32 %v497_v57, %v55_v56 }
  0x30   :  { %v82_v59 = vmul.f32 1.25, %v81_v58 }
  0x32   :  { %v370_v60 = vpack.c.bf16 %v82_v59, %v82_v59 }
  0x34   :  { %v376_v61 = vsel %vm371_vm4, %v370_v60, 0 }
  0xdf   :  { %v145_v16 = vpop.f32.mrb[0].mxu0 }
  0xe0   :  { %v146_v17 = vadd.f32 %v498_v15, %v145_v16  ;;  %v548_v18 = vpop.f32.mrb[1].mxu0  ;;  %v517_v15 = vsel %vm362_vm5, 1.0, %v641_v2 }
  0xe1   :  { %v148_v19 = vpop.f32.mrb[2].mxu0 }
  0xe2   :  { %v151_v20 = vmax.f32 %v146_v17, 0.0  ;;  %v549_v21 = vpop.f32.mrb[3].mxu0 }
  0xe4   :  { %v152_v22 = vpack.c.bf16 %v151_v20, %v151_v20 }
  0xe6   :  { %567 = vmatmul.mubr.bf16.vlgmr.msra.gmra.mrb[0].mxu1 %v152_v22 }
 0x1b9   :  { %v258_v26 = vpop.f32.mrb[0].mxu1 }
 0x1ba   :  { %v259_v27 = vadd.f32 %v502_v25, %v258_v26  ;;  %v568_v28 = vpop.f32.mrb[1].mxu1 }
 0x1bb   :  { %v261_v29 = vpop.f32.mrb[2].mxu1  ;;  %v468_v28 = vpop.permute.xlu0 %467 }
 0x1bc   :  { %v264_v30 = vmax.f32 %v259_v27, 0.0  ;;  %v569_v31 = vpop.f32.mrb[3].mxu1 }
 0x1be   :  { %v265_v32 = vpack.c.bf16 %v264_v30, %v264_v30 }
 0x1c0   :  { %579 = vmatmul.mubr.msk.bf16.vlgmr.msra.gmra.mrb[4].mxu0 %vm305_vm2, %v265_v32 }
 0x1c1   :  { %584 = vmatprep.mubr.msk.bf16.mxu0 %vm642_vm0, %v641_v2  ;;  %583 = vmatpush3.bf16.xpose.msra.mxu0 %v376_v61 }
 0x1c2   :  { %588 = vmatprep.subr.bf16.mxu0 %v641_v2 }
 0x1c8   :  { %585 = vmatmul.mubr.msk.bf16.vlgmr.msra.gmra.mrb[8].mxu0 %vm371_vm4, %v369_v62 }
 0x1c9   :  { %590 = vmatprep.mubr.msk.bf16.mxu0 %vm642_vm0, %v641_v2  ;;  %v472_v2 = vsub.s32 0, %v793_v34 }
 0x1cb   :  { %v473_v29 = vrot.slane %v468_v28, %v472_v2 }
 0x293   :  { %v343_v12 = vpop.f32.mrb[4].mxu0 }
 0x294   :  { %v344_v13 = vadd.f32 %v511_v11, %v343_v12  ;;  %v580_v14 = vpop.f32.mrb[5].mxu0 }
 0x295   :  { %v346_v16 = vpop.f32.mrb[6].mxu0 }
 0x296   :  { %v349_v17 = vmax.f32 %v344_v13, 0.0  ;;  %v581_v18 = vpop.f32.mrb[7].mxu0 }
 0x298   :  { %v365_v19 = vmul.f32 %v517_v15, %v349_v17 }
 0x29a   :  { %v366_v20 = vmul.f32 1.25, %v365_v19 }
 0x29b   :  { %v412_v24 = vpop.f32.mrb[8].mxu0 }
 0x29c   :  { %v368_v21 = vpack.c.bf16 %v366_v20, %v366_v20  ;;  %v586_v25 = vpop.f32.mrb[9].mxu0 }
 0x29d   :  { %v415_v26 = vpop.f32.mrb[10].mxu0 }
 0x29e   :  { %v422_v22 = vsel %vm107_vm1, %v368_v21, 0  ;;  %v587_v27 = vpop.f32.mrb[11].mxu0 }
 0x29f   :  { %589 = vmatpush3.bf16.xpose.msra.mxu0 %v422_v22 }
 0x2a6   :  { %591 = vmatmul.mubr.msk.bf16.vlgmr.msra.gmra.mrb[12].mxu0 %vm107_vm1, %v367_v23 }
 0x379   :  { %v458_v30 = vpop.f32.mrb[12].mxu0 }
 0x37a   :  { %v459_v31 = vadd.f32 %v458_v30, %v412_v24  ;;  %v592_v32 = vpop.f32.mrb[13].mxu0 }
 0x37b   :  { %v461_v33 = vpop.f32.mrb[14].mxu0 }
 0x37c   :  { %v474_v35 = vadd.f32 %v473_v29, %v459_v31  ;;  %v593_v36 = vpop.f32.mrb[15].mxu0 }
 0x37e   :  { %v520_v37 = vmul.f32 -1.442695, %v474_v35 }
 0x380   :  { %613 = vpow2.f32 %v520_v37 }
 0x38a   :  { %v614_v38 = vpop.eup %613 }
 0x38b   :  { %v478_v39 = vadd.f32 1.0, %v614_v38 }
 0x38d   :  { %615 = vrcp.f32 %v478_v39 }
 0x397   :  { %v616_v40 = vpop.eup %615 }
 0x398   :  { %482 = vst.msk [vmem:[#allocation4] sm:$0x1] %vm481_vm6, %v616_v40 }
 0x399   :  { %628 = shalt.err (!%p625_p4)
}
 0x39a   :  { %s629_s14 = scalar_lea.hbm %s847_s13, 16 }
 0x39b   :  { %p630_p5 = scmp.ne.s32.totalorder %s847_s13, %s629_s14  ;;  %p633_p6 = scmp.lt.u32.totalorder %s629_s14, %s847_s13 }
 0x39d   :  { %p635_p7 = pnand %p633_p6, %p630_p5 }
 0x39f   :  { %638 = shalt.err (!%p635_p7)
}
 0x3a0   :  { %492 = dma.vmem_to_hbm [thread:$0]  %s490_s10, 16, %s847_s13, [#allocation5]  }
 0x3a1   :  { %639 = dma.done.wait [#allocation5], 16  }
 0x3a2   :  { %640 = vsyncadd [#allocation5], 4294967280 }
 0x3a3   :  { %496 = vsyncpa [#allocation5], 1 }

</bundles_post_ra>
